<compile_context>
chip_gen: v5e
topology: v5e:2x2
jax: 0.10.0
libtpu: 0.0.40
codegen_flags: <defaults>
</compile_context>

<pallas_src>
import jax
import jax.numpy as jnp
from jax.experimental import pallas as pl
from jax.experimental.pallas import tpu as pltpu


def _round_up(n, m):
    return ((n + m - 1) // m) * m


def _leaky_relu(x, slope=0.2):
    return jnp.where(x > 0, x, slope * x)


def discriminator_kernel(x_ref, w1_ref, b1_ref, w2_ref, b2_ref, w3_ref, b3_ref,
                         out_ref):
    # x tile: (TB, D) bf16
    x = x_ref[...]

    # Layer 1: Linear(D -> 512) + LeakyReLU(0.2)   (MXU, bf16 in / f32 acc)
    h1 = jnp.dot(x, w1_ref[...], preferred_element_type=jnp.float32)
    h1 = _leaky_relu(h1 + b1_ref[...])

    # Layer 2: Linear(512 -> 256) + LeakyReLU(0.2)
    h2 = jnp.dot(h1.astype(jnp.bfloat16), w2_ref[...],
                 preferred_element_type=jnp.float32)
    h2 = _leaky_relu(h2 + b2_ref[...])

    # Layer 3: Linear(256 -> 1).  N=1 matmul would waste the MXU; do a VPU
    # multiply + lane (XLU) reduction instead.
    w3_row = w3_ref[...]                                     # (1, 256) f32
    z = jnp.sum(h2 * w3_row, axis=-1, keepdims=True) + b3_ref[...]   # (TB, 1)

    # Sigmoid: exp on the EUP + approx reciprocal (EUP) keeps the VPU free.
    sig = pl.reciprocal(1.0 + jnp.exp(-z), approx=True)      # (TB, 1)

    # Lane-dense store: fill all 128 lanes (unmasked vst); wrapper slices col 0.
    out_ref[...] = jnp.broadcast_to(sig, out_ref.shape).astype(out_ref.dtype)


def discriminator_forward(x, params, *, block_b=256):
    """x: (B, D) float32. params: dict of (in, out)-layout weights/biases."""
    B, D = x.shape

    # Batch tile: multiple of 8 sublanes, capped (v5e-friendly default 256).
    tb = min(block_b, _round_up(B, 8))
    Bp = _round_up(B, tb)
    x_p = x if Bp == B else jnp.pad(x, ((0, Bp - B), (0, 0)))

    # MXU operands in bf16; biases and the final (1, 256) row stay f32.
    xb = x_p.astype(jnp.bfloat16)
    w1 = params["w1"].astype(jnp.bfloat16)                    # (D, 512)
    w2 = params["w2"].astype(jnp.bfloat16)                    # (512, 256)
    w3_row = params["w3"].T.astype(jnp.float32)               # (1, 256)
    b1, b2, b3 = params["b1"], params["b2"], params["b3"]     # (1,512)(1,256)(1,1)

    grid = (Bp // tb,)
    out = pl.pallas_call(
        discriminator_kernel,
        out_shape=jax.ShapeDtypeStruct((Bp, 128), jnp.float32),
        grid=grid,
        in_specs=[
            pl.BlockSpec((tb, D), lambda i: (i, 0)),          # streamed x tile
            pl.BlockSpec(w1.shape, lambda i: (0, 0)),          # resident weights
            pl.BlockSpec(b1.shape, lambda i: (0, 0)),
            pl.BlockSpec(w2.shape, lambda i: (0, 0)),
            pl.BlockSpec(b2.shape, lambda i: (0, 0)),
            pl.BlockSpec(w3_row.shape, lambda i: (0, 0)),
            pl.BlockSpec(b3.shape, lambda i: (0, 0)),
        ],
        out_specs=pl.BlockSpec((tb, 128), lambda i: (i, 0)),   # lane-dense out
        compiler_params=pltpu.CompilerParams(
            dimension_semantics=("parallel",),
            vmem_limit_bytes=48 * 1024 * 1024,
        ),
    )(xb, w1, b1, w2, b2, w3_row, b3)

    # Undo padding + lane padding: real result lives in column 0.
    return out[:B, :1]


def init_params(key, input_size):
    """Deterministic init mirroring nn.Linear; stored as (in, out) so the
    kernel computes x @ W directly."""
    ks = jax.random.split(key, 6)

    def lin(kw, kb, fan_in, fan_out):
        bound = 1.0 / jnp.sqrt(fan_in)
        w = jax.random.uniform(kw, (fan_in, fan_out), jnp.float32, -bound, bound)
        b = jax.random.uniform(kb, (1, fan_out), jnp.float32, -bound, bound)
        return w, b

    w1, b1 = lin(ks[0], ks[1], input_size, 512)
    w2, b2 = lin(ks[2], ks[3], 512, 256)
    w3, b3 = lin(ks[4], ks[5], 256, 1)
    return {"w1": w1, "b1": b1, "w2": w2, "b2": b2, "w3": w3, "b3": b3}


def reference_forward(x, p):
    """Pure-JAX reference with the same bf16 matmul precision as the kernel."""
    h1 = jnp.dot(x.astype(jnp.bfloat16), p["w1"].astype(jnp.bfloat16),
                 preferred_element_type=jnp.float32) + p["b1"]
    h1 = _leaky_relu(h1)
    h2 = jnp.dot(h1.astype(jnp.bfloat16), p["w2"].astype(jnp.bfloat16),
                 preferred_element_type=jnp.float32) + p["b2"]
    h2 = _leaky_relu(h2)
    z = h2 @ p["w3"] + p["b3"]
    return jax.nn.sigmoid(z)


if __name__ == "__main__":
    key = jax.random.PRNGKey(0)
    k_x, k_p = jax.random.split(key)

    B = 8                       # batch
    D = 32                      # discriminator_input_size
    x = jax.random.normal(k_x, (B, D), jnp.float32)
    params = init_params(k_p, D)

    out = discriminator_forward(x, params)
    out = jax.block_until_ready(out)

    ref = reference_forward(x, params)
    assert out.shape == (B, 1), out.shape
    # bf16 matmuls + approx reciprocal -> relaxed tolerance vs f32-exact path.
    assert jnp.allclose(out, ref, atol=5e-3, rtol=5e-3), (out, ref)

    print("KERNEL_OK")
</pallas_src>

<mosaic_0001>
module attributes {stable_mosaic.version = 11 : i64} {
  func.func @discriminator_kernel(%arg0: i32, %arg1: memref<8x32xbf16, #tpu.memory_space<vmem>>, %arg2: memref<32x512xbf16, #tpu.memory_space<vmem>>, %arg3: memref<1x512xf32, #tpu.memory_space<vmem>>, %arg4: memref<512x256xbf16, #tpu.memory_space<vmem>>, %arg5: memref<1x256xf32, #tpu.memory_space<vmem>>, %arg6: memref<1x256xf32, #tpu.memory_space<vmem>>, %arg7: memref<1x1xf32, #tpu.memory_space<vmem>>, %arg8: memref<8x128xf32, #tpu.memory_space<vmem>>) attributes {dimension_semantics = [#tpu.dimension_semantics<parallel>], iteration_bounds = array<i64: 1>, scalar_prefetch = 0 : i64, scratch_operands = 0 : i64, tpu.core_type = #tpu.core_type<tc>, window_params = [{transform_indices = @transform_0, window_bounds = array<i64: 8, 32>}, {pipeline_mode = #tpu.pipeline_mode<synchronous>, transform_indices = @transform_1, window_bounds = array<i64: 32, 512>}, {pipeline_mode = #tpu.pipeline_mode<synchronous>, transform_indices = @transform_2, window_bounds = array<i64: 1, 512>}, {pipeline_mode = #tpu.pipeline_mode<synchronous>, transform_indices = @transform_3, window_bounds = array<i64: 512, 256>}, {pipeline_mode = #tpu.pipeline_mode<synchronous>, transform_indices = @transform_4, window_bounds = array<i64: 1, 256>}, {pipeline_mode = #tpu.pipeline_mode<synchronous>, transform_indices = @transform_5, window_bounds = array<i64: 1, 256>}, {pipeline_mode = #tpu.pipeline_mode<synchronous>, transform_indices = @transform_6, window_bounds = array<i64: 1, 1>}, {transform_indices = @transform_7, window_bounds = array<i64: 8, 128>}]} {
    %c0 = arith.constant 0 : index
    %c0_0 = arith.constant 0 : index
    %0 = vector.load %arg1[%c0, %c0_0] : memref<8x32xbf16, #tpu.memory_space<vmem>>, vector<8x32xbf16>
    %c0_1 = arith.constant 0 : index
    %c0_2 = arith.constant 0 : index
    %1 = vector.load %arg2[%c0_1, %c0_2] : memref<32x512xbf16, #tpu.memory_space<vmem>>, vector<32x512xbf16>
    %cst = arith.constant dense<0.000000e+00> : vector<8x512xf32>
    %2 = tpu.matmul %0, %1, %cst {dimension_numbers = #tpu.dot_dimension_numbers<[1], [0], [0], [1], [0, 0, 1, 1], [], []>} : vector<8x32xbf16>, vector<32x512xbf16>, vector<8x512xf32> -> vector<8x512xf32>
    %c0_3 = arith.constant 0 : index
    %c0_4 = arith.constant 0 : index
    %3 = vector.load %arg3[%c0_3, %c0_4] : memref<1x512xf32, #tpu.memory_space<vmem>>, vector<1x512xf32>
    %4 = vector.broadcast %3 : vector<1x512xf32> to vector<8x512xf32>
    %5 = arith.addf %2, %4 : vector<8x512xf32>
    %cst_5 = arith.constant 0.000000e+00 : f32
    %6 = vector.broadcast %cst_5 : f32 to vector<8x512xf32>
    %7 = arith.cmpf ogt, %5, %6 : vector<8x512xf32>
    %cst_6 = arith.constant 2.000000e-01 : f32
    %8 = vector.broadcast %cst_6 : f32 to vector<8x512xf32>
    %9 = arith.mulf %8, %5 : vector<8x512xf32>
    %10 = arith.select %7, %5, %9 : vector<8x512xi1>, vector<8x512xf32>
    %11 = arith.truncf %10 : vector<8x512xf32> to vector<8x512xbf16>
    %c0_7 = arith.constant 0 : index
    %c0_8 = arith.constant 0 : index
    %12 = vector.load %arg4[%c0_7, %c0_8] : memref<512x256xbf16, #tpu.memory_space<vmem>>, vector<512x256xbf16>
    %cst_9 = arith.constant dense<0.000000e+00> : vector<8x256xf32>
    %13 = tpu.matmul %11, %12, %cst_9 {dimension_numbers = #tpu.dot_dimension_numbers<[1], [0], [0], [1], [0, 0, 1, 1], [], []>} : vector<8x512xbf16>, vector<512x256xbf16>, vector<8x256xf32> -> vector<8x256xf32>
    %c0_10 = arith.constant 0 : index
    %c0_11 = arith.constant 0 : index
    %14 = vector.load %arg5[%c0_10, %c0_11] : memref<1x256xf32, #tpu.memory_space<vmem>>, vector<1x256xf32>
    %15 = vector.broadcast %14 : vector<1x256xf32> to vector<8x256xf32>
    %16 = arith.addf %13, %15 : vector<8x256xf32>
    %cst_12 = arith.constant 0.000000e+00 : f32
    %17 = vector.broadcast %cst_12 : f32 to vector<8x256xf32>
    %18 = arith.cmpf ogt, %16, %17 : vector<8x256xf32>
    %cst_13 = arith.constant 2.000000e-01 : f32
    %19 = vector.broadcast %cst_13 : f32 to vector<8x256xf32>
    %20 = arith.mulf %19, %16 : vector<8x256xf32>
    %21 = arith.select %18, %16, %20 : vector<8x256xi1>, vector<8x256xf32>
    %c0_14 = arith.constant 0 : index
    %c0_15 = arith.constant 0 : index
    %22 = vector.load %arg6[%c0_14, %c0_15] : memref<1x256xf32, #tpu.memory_space<vmem>>, vector<1x256xf32>
    %23 = vector.broadcast %22 : vector<1x256xf32> to vector<8x256xf32>
    %24 = arith.mulf %21, %23 : vector<8x256xf32>
    %cst_16 = arith.constant dense<0.000000e+00> : vector<8xf32>
    %25 = vector.multi_reduction <add>, %24, %cst_16 [1] : vector<8x256xf32> to vector<8xf32>
    %26 = vector.shape_cast %25 : vector<8xf32> to vector<8x1xf32>
    %c0_17 = arith.constant 0 : index
    %c0_18 = arith.constant 0 : index
    %27 = vector.load %arg7[%c0_17, %c0_18] : memref<1x1xf32, #tpu.memory_space<vmem>>, vector<1x1xf32>
    %28 = vector.broadcast %27 : vector<1x1xf32> to vector<8x1xf32>
    %29 = arith.addf %26, %28 : vector<8x1xf32>
    %cst_19 = arith.constant 0.000000e+00 : f32
    %30 = vector.broadcast %cst_19 : f32 to vector<8x1xf32>
    %31 = arith.subf %30, %29 : vector<8x1xf32>
    %32 = math.exp %31 : vector<8x1xf32>
    %cst_20 = arith.constant 1.000000e+00 : f32
    %33 = vector.broadcast %cst_20 : f32 to vector<8x1xf32>
    %34 = arith.addf %33, %32 : vector<8x1xf32>
    %35 = tpu.reciprocal %34 {approx = true} : vector<8x1xf32> -> vector<8x1xf32>
    %36 = vector.shape_cast %35 : vector<8x1xf32> to vector<8x1xf32>
    %37 = vector.broadcast %36 : vector<8x1xf32> to vector<8x128xf32>
    %c0_21 = arith.constant 0 : index
    %c0_22 = arith.constant 0 : index
    %38 = vector.load %arg8[%c0_21, %c0_22] : memref<8x128xf32, #tpu.memory_space<vmem>>, vector<8x128xf32>
    tpu.vector_store %arg8[%c0_21, %c0_22], %37 {strides = array<i32>} : memref<8x128xf32, #tpu.memory_space<vmem>>, vector<8x128xf32>,
    return
  }
  func.func @transform_0(%arg0: i32) -> (i32, i32) {
    %c0_i32 = arith.constant 0 : i32
    %c0_i32_0 = arith.constant 0 : i32
    return %arg0, %c0_i32 : i32, i32
  }
  func.func @transform_1(%arg0: i32) -> (i32, i32) {
    %c0_i32 = arith.constant 0 : i32
    %c0_i32_0 = arith.constant 0 : i32
    %c0_i32_1 = arith.constant 0 : i32
    return %c0_i32, %c0_i32_0 : i32, i32
  }
  func.func @transform_2(%arg0: i32) -> (i32, i32) {
    %c0_i32 = arith.constant 0 : i32
    %c0_i32_0 = arith.constant 0 : i32
    %c0_i32_1 = arith.constant 0 : i32
    return %c0_i32, %c0_i32_0 : i32, i32
  }
  func.func @transform_3(%arg0: i32) -> (i32, i32) {
    %c0_i32 = arith.constant 0 : i32
    %c0_i32_0 = arith.constant 0 : i32
    %c0_i32_1 = arith.constant 0 : i32
    return %c0_i32, %c0_i32_0 : i32, i32
  }
  func.func @transform_4(%arg0: i32) -> (i32, i32) {
    %c0_i32 = arith.constant 0 : i32
    %c0_i32_0 = arith.constant 0 : i32
    %c0_i32_1 = arith.constant 0 : i32
    return %c0_i32, %c0_i32_0 : i32, i32
  }
  func.func @transform_5(%arg0: i32) -> (i32, i32) {
    %c0_i32 = arith.constant 0 : i32
    %c0_i32_0 = arith.constant 0 : i32
    %c0_i32_1 = arith.constant 0 : i32
    return %c0_i32, %c0_i32_0 : i32, i32
  }
  func.func @transform_6(%arg0: i32) -> (i32, i32) {
    %c0_i32 = arith.constant 0 : i32
    %c0_i32_0 = arith.constant 0 : i32
    %c0_i32_1 = arith.constant 0 : i32
    return %c0_i32, %c0_i32_0 : i32, i32
  }
  func.func @transform_7(%arg0: i32) -> (i32, i32) {
    %c0_i32 = arith.constant 0 : i32
    %c0_i32_0 = arith.constant 0 : i32
    return %arg0, %c0_i32 : i32, i32
  }
}

</mosaic_0001>

<bundles_post_ra>
// kernel: tpu_custom_call.1
= control target key start
LH: loop header
LB: loop body
LE: loop exit
PB: predicated region body
PF: predicated region fallthrough
CT: control target
= control target key end

     0   :  { %s1352_s0 = inlined_call_operand.hbm [shape: bf16[8,32], index: 0, kind: input, shape index: {}]   ;;  %s1353_s1 = inlined_call_operand.hbm [shape: bf16[32,512], index: 1, kind: input, shape index: {}]   ;;  %s1354_s2 = inlined_call_operand.hbm [shape: f32[1,512], index: 2, kind: input, shape index: {}]   ;;  %s1355_s3 = inlined_call_operand.hbm [shape: bf16[512,256], index: 3, kind: input, shape index: {}]   ;;  %s1356_s4 = inlined_call_operand.vmem [shape: f32[1,256], index: 4, kind: input, shape index: {}]   ;;  %s1357_s5 = inlined_call_operand.vmem [shape: f32[1,256], index: 5, kind: input, shape index: {}]   ;;  %s1358_s6 = inlined_call_operand.<no memory space> [shape: f32[1,1], index: 6, kind: input, shape index: {}]   ;;  %s1359_s7 = inlined_call_operand.hbm [shape: f32[8,128], index: 7, kind: output, shape index: {}]  }
   0x1   :  { %v12_v0 = vstv %s1358_s6 }
   0x2   :  { %13 = vst [vmem:[#allocation2] sm:$0x1] %v12_v0 }
   0x3   :  { %14 = vsyncpa [#allocation4], 0 }
   0x4   :  { %15 = vsyncpa [#allocation7], 0 }
   0x5   :  { %16 = vsyncpa [#allocation10], 0  ;;  %s33_s28 = sshll.u32 %s1353_s1, 4  ;;  %s34_s28 = int_to_ptr.hbm [resolvable:$true] %s33_s28 }
   0x6   :  { %17 = vsyncpa [#allocation5], 0  ;;  %s1274_s29 = smov [#allocation6]   ;;  %s23_s10 = sshll.u32 %s1352_s0, 4  ;;  %s24_s10 = int_to_ptr.hbm [resolvable:$true] %s23_s10 }
   0x7   :  { %s35_s30 = sshll.u32 %s1274_s29, 4  ;;  %s1275_s11 = smov 256   ;;  %s36_s30 = int_to_ptr.vmem [resolvable:$true] %s35_s30 }
   0x8   :  { %s1276_s12 = smov 16   ;;  %s1277_s6 = smov [#allocation3]  }
   0x9   :  { %41 = dma.hbm_to_vmem [thread:$0]  %s34_s28, 1024, %s36_s30, [#allocation7], %s1275_s11, %s1275_s11, %s1276_s12  }
   0xa   :  { %s25_s13 = sshll.u32 %s1277_s6, 4  ;;  %s47_s16 = sshll.u32 %s1354_s2, 4  ;;  %s26_s13 = int_to_ptr.vmem [resolvable:$true] %s25_s13  ;;  %s48_s16 = int_to_ptr.hbm [resolvable:$true] %s47_s16 }
   0xb   :  { %28 = dma.hbm_to_vmem [thread:$0]  %s24_s10, 64, %s26_s13, [#allocation4]  }
   0xc   :  { %s57_s18 = sshll.u32 %s1355_s3, 4  ;;  %s1278_s19 = smov [#allocation8]   ;;  %s58_s18 = int_to_ptr.hbm [resolvable:$true] %s57_s18 }
   0xd   :  { %s49_s20 = sshll.u32 %s1278_s19, 4  ;;  %s1279_s0 = smov [#allocation9]   ;;  %s50_s20 = int_to_ptr.vmem [resolvable:$true] %s49_s20 }
   0xe   :  { %52 = dma.hbm_to_vmem [thread:$0]  %s48_s16, 64, %s50_s20, [#allocation7]  }
   0xf   :  { %s59_s21 = sshll.u32 %s1279_s0, 4  ;;  %s1280_s22 = smov 128   ;;  %s60_s21 = int_to_ptr.vmem [resolvable:$true] %s59_s21 }
  0x10   :  { %s1281_s23 = smov 8  }
  0x11   :  { %65 = dma.hbm_to_vmem [thread:$0]  %s58_s18, 8192, %s60_s21, [#allocation10], %s1280_s22, %s1280_s22, %s1281_s23  }
  0x12   :  { %1266 = dma.done.wait [#allocation4], 64  }
  0x13   :  { %1267 = vsyncadd [#allocation4], 4294967232 }
  0x14   :  { %1268 = dma.done.wait [#allocation7], 1088  }
  0x15   :  { %1269 = vsyncadd [#allocation7], 4294966208 }
  0x16   :  { %1270 = dma.done.wait [#allocation10], 8192  }
  0x17   :  { %1271 = vsyncadd [#allocation10], 4294959104  ;;  %vm148_vm0 = vcmask 261120   ;;  %v784_v1 = vld [vmem:[#allocation6 + $0x20] sm:$0xf]  ;;  %s754_s28 = sshll.u32 %s1359_s7, 4  ;;  %s755_s28 = int_to_ptr.hbm [resolvable:$true] %s754_s28 }
  0x18   :  { %v1064_v2 = vld [vmem:[#allocation6 + $0x2c] sm:$0xf0]  ;;  %v1062_v3 = vld [vmem:[#allocation6 + $0x24] sm:$0xf]  ;;  %v786_v5 = vld [vmem:[#allocation6 + $0x30] sm:$0xf0] }
  0x19   :  { %v785_v4 = vor.u32 %v1064_v2, %v784_v1  ;;  %v792_v6 = vld [vmem:[#allocation6 + $0x28] sm:$0xf]  ;;  %v1065_v7 = vld [vmem:[#allocation6 + $0x34] sm:$0xf0]  ;;  %v789_v8 = vor.u32 %v1062_v3, %v786_v5  ;;  %v1063_v10 = vld [vmem:[#allocation6 + $0x2c] sm:$0xf] }
  0x1a   :  { %v793_v9 = vor.u32 %v1065_v7, %v792_v6  ;;  %v794_v11 = vld [vmem:[#allocation6 + $0x38] sm:$0xf0]  ;;  %v768_v12 = vld [vmem:[#allocation6] sm:$0xf]  ;;  %v1060_v14 = vld [vmem:[#allocation6 + $0xc] sm:$0xf0] }
  0x1b   :  { %158 = vmatpush.bf16.msra.mxu0 %v785_v4  ;;  %v797_v13 = vor.u32 %v1063_v10, %v794_v11  ;;  %v1058_v15 = vld [vmem:[#allocation6 + $0x4] sm:$0xf]  ;;  %v770_v16 = vld [vmem:[#allocation6 + $0x10] sm:$0xf0]  ;;  %171 = vmatpush.bf16.msra.mxu1 %v789_v8  ;;  %v769_v17 = vor.u32 %v1060_v14, %v768_v12  ;;  %v776_v19 = vld [vmem:[#allocation6 + $0x8] sm:$0xf] }
  0x1c   :  { %184 = vmatpush.bf16.msra.mxu2 %v793_v9  ;;  %v773_v18 = vor.u32 %v1058_v15, %v770_v16  ;;  %v1061_v20 = vld [vmem:[#allocation6 + $0x14] sm:$0xf0]  ;;  %v1059_v21 = vld [vmem:[#allocation6 + $0xc] sm:$0xf]  ;;  %v778_v23 = vld [vmem:[#allocation6 + $0x18] sm:$0xf0] }
  0x1d   :  { %197 = vmatpush.bf16.msra.mxu3 %v797_v13  ;;  %v777_v22 = vor.u32 %v1061_v20, %v776_v19  ;;  %v89_v24 = vld [vmem:[#allocation3] sm:$0xf]  ;;  %v860_v25 = vld [vmem:[#allocation9 + $0x70] sm:$0xf]  ;;  %v781_v26 = vor.u32 %v1059_v21, %v778_v23  ;;  %v852_v32 = vld [vmem:[#allocation9 + $0x60] sm:$0xf] }
  0x1e   :  { %v1081_v27 = vld [vmem:[#allocation9 + $0x74] sm:$0xf0]  ;;  %v924_v28 = vld [vmem:[#allocation9 + $0xf0] sm:$0xf]  ;;  %v1079_v33 = vld [vmem:[#allocation9 + $0x64] sm:$0xf0] }
  0x1f   :  { %v1097_v29 = vld [vmem:[#allocation9 + $0xf4] sm:$0xf0]  ;;  %159 = vmatpush.bf16.msra.mxu0 %v769_v17  ;;  %v861_v30 = vor.u32 %v1081_v27, %v860_v25  ;;  %v916_v34 = vld [vmem:[#allocation9 + $0xe0] sm:$0xf]  ;;  %172 = vmatpush.bf16.msra.mxu1 %v773_v18  ;;  %v1095_v35 = vld [vmem:[#allocation9 + $0xe4] sm:$0xf0]  ;;  %v853_v38 = vor.u32 %v1079_v33, %v852_v32 }
  0x20   :  { %v925_v31 = vor.u32 %v1097_v29, %v924_v28  ;;  %185 = vmatpush.bf16.msra.mxu2 %v777_v22  ;;  %v988_v36 = vld [vmem:[#allocation9 + $0x170] sm:$0xf]  ;;  %v1113_v37 = vld [vmem:[#allocation9 + $0x174] sm:$0xf0]  ;;  %v917_v43 = vor.u32 %v1095_v35, %v916_v34  ;;  %v980_v48 = vld [vmem:[#allocation9 + $0x160] sm:$0xf] }
  0x21   :  { %198 = vmatpush.bf16.msra.mxu3 %v781_v26  ;;  %v989_v39 = vor.u32 %v1113_v37, %v988_v36  ;;  %v1052_v40 = vld [vmem:[#allocation9 + $0x1f0] sm:$0xf]  ;;  %v1129_v41 = vld [vmem:[#allocation9 + $0x1f4] sm:$0xf0]  ;;  %v1111_v49 = vld [vmem:[#allocation9 + $0x164] sm:$0xf0] }
  0x22   :  { %v844_v42 = vld [vmem:[#allocation9 + $0x50] sm:$0xf]  ;;  %798 = vmatmul.msk.bf16.vlgmr.msra.gmra.mxu0 %vm148_vm0, %v89_v24  ;;  %v1053_v44 = vor.u32 %v1129_v41, %v1052_v40  ;;  %v1077_v45 = vld [vmem:[#allocation9 + $0x54] sm:$0xf0]  ;;  %799 = vmatmul.msk.bf16.vlgmr.msra.gmra.mxu1 %vm148_vm0, %v89_v24  ;;  %v1044_v50 = vld [vmem:[#allocation9 + $0x1e0] sm:$0xf]  ;;  %v981_v51 = vor.u32 %v1111_v49, %v980_v48 }
  0x23   :  { %610 = vmatpush.bf16.msrb.mxu0 %v861_v30  ;;  %623 = vmatpush.bf16.msrb.mxu1 %v925_v31  ;;  %v908_v46 = vld [vmem:[#allocation9 + $0xd0] sm:$0xf]  ;;  %v1093_v47 = vld [vmem:[#allocation9 + $0xd4] sm:$0xf0]  ;;  %v1127_v52 = vld [vmem:[#allocation9 + $0x1e4] sm:$0xf0]  ;;  %v845_v53 = vor.u32 %v1077_v45, %v844_v42 }
  0x24   :  { %800 = vmatmul.msk.bf16.vlgmr.msra.gmra.mxu2 %vm148_vm0, %v89_v24  ;;  %801 = vmatmul.msk.bf16.vlgmr.msra.gmra.mxu3 %vm148_vm0, %v89_v24  ;;  %v1045_v54 = vor.u32 %v1127_v52, %v1044_v50  ;;  %v836_v55 = vld [vmem:[#allocation9 + $0x40] sm:$0xf]  ;;  %v1075_v56 = vld [vmem:[#allocation9 + $0x44] sm:$0xf0]  ;;  %v972_v57 = vld [vmem:[#allocation9 + $0x150] sm:$0xf]  ;;  %v909_v58 = vor.u32 %v1093_v47, %v908_v46 }
  0x25   :  { %636 = vmatpush.bf16.msrb.mxu2 %v989_v39  ;;  %649 = vmatpush.bf16.msrb.mxu3 %v1053_v44  ;;  %v1109_v59 = vld [vmem:[#allocation9 + $0x154] sm:$0xf0]  ;;  %v1036_v60 = vld [vmem:[#allocation9 + $0x1d0] sm:$0xf]  ;;  %v900_v62 = vld [vmem:[#allocation9 + $0xc0] sm:$0xf]  ;;  %v837_v1 = vor.u32 %v1075_v56, %v836_v55 }
  0x26   :  { %v1125_v61 = vld [vmem:[#allocation9 + $0x1d4] sm:$0xf0]  ;;  %v1091_v63 = vld [vmem:[#allocation9 + $0xc4] sm:$0xf0]  ;;  %v973_v0 = vor.u32 %v1109_v59, %v972_v57  ;;  %v828_v3 = vld [vmem:[#allocation9 + $0x30] sm:$0xf] }
  0x27   :  { %611 = vmatpush.bf16.msrb.mxu0 %v853_v38  ;;  %624 = vmatpush.bf16.msrb.mxu1 %v917_v43  ;;  %v1037_v2 = vor.u32 %v1125_v61, %v1036_v60  ;;  %v964_v4 = vld [vmem:[#allocation9 + $0x140] sm:$0xf]  ;;  %v1107_v5 = vld [vmem:[#allocation9 + $0x144] sm:$0xf0]  ;;  %v901_v6 = vor.u32 %v1091_v63, %v900_v62  ;;  %v1073_v7 = vld [vmem:[#allocation9 + $0x34] sm:$0xf0] }
  0x28   :  { %v1028_v8 = vld [vmem:[#allocation9 + $0x1c0] sm:$0xf]  ;;  %v1123_v9 = vld [vmem:[#allocation9 + $0x1c4] sm:$0xf0]  ;;  %v892_v10 = vld [vmem:[#allocation9 + $0xb0] sm:$0xf]  ;;  %v965_v12 = vor.u32 %v1107_v5, %v964_v4  ;;  %v829_v13 = vor.u32 %v1073_v7, %v828_v3 }
  0x29   :  { %637 = vmatpush.bf16.msrb.mxu2 %v981_v51  ;;  %650 = vmatpush.bf16.msrb.mxu3 %v1045_v54  ;;  %v1089_v11 = vld [vmem:[#allocation9 + $0xb4] sm:$0xf0]  ;;  %v1029_v14 = vor.u32 %v1123_v9, %v1028_v8  ;;  %v820_v15 = vld [vmem:[#allocation9 + $0x20] sm:$0xf]  ;;  %v956_v16 = vld [vmem:[#allocation9 + $0x130] sm:$0xf] }
  0x2a   :  { %v1105_v17 = vld [vmem:[#allocation9 + $0x134] sm:$0xf0]  ;;  %v893_v18 = vor.u32 %v1089_v11, %v892_v10  ;;  %v1071_v19 = vld [vmem:[#allocation9 + $0x24] sm:$0xf0]  ;;  %v1020_v20 = vld [vmem:[#allocation9 + $0x1b0] sm:$0xf] }
  0x2b   :  { %612 = vmatpush.bf16.msrb.mxu0 %v845_v53  ;;  %625 = vmatpush.bf16.msrb.mxu1 %v909_v58  ;;  %v1121_v21 = vld [vmem:[#allocation9 + $0x1b4] sm:$0xf0]  ;;  %v884_v22 = vld [vmem:[#allocation9 + $0xa0] sm:$0xf]  ;;  %v1087_v23 = vld [vmem:[#allocation9 + $0xa4] sm:$0xf0]  ;;  %v957_v24 = vor.u32 %v1105_v17, %v956_v16  ;;  %v821_v25 = vor.u32 %v1071_v19, %v820_v15 }
  0x2c   :  { %v1021_v26 = vor.u32 %v1121_v21, %v1020_v20  ;;  %v812_v27 = vld [vmem:[#allocation9 + $0x10] sm:$0xf]  ;;  %v948_v28 = vld [vmem:[#allocation9 + $0x120] sm:$0xf]  ;;  %v1103_v29 = vld [vmem:[#allocation9 + $0x124] sm:$0xf0]  ;;  %v885_v30 = vor.u32 %v1087_v23, %v884_v22 }
  0x2d   :  { %638 = vmatpush.bf16.msrb.mxu2 %v973_v0  ;;  %651 = vmatpush.bf16.msrb.mxu3 %v1037_v2  ;;  %v1069_v31 = vld [vmem:[#allocation9 + $0x14] sm:$0xf0]  ;;  %v1012_v32 = vld [vmem:[#allocation9 + $0x1a0] sm:$0xf]  ;;  %v1119_v33 = vld [vmem:[#allocation9 + $0x1a4] sm:$0xf0]  ;;  %v949_v36 = vor.u32 %v1103_v29, %v948_v28 }
  0x2e   :  { %v876_v34 = vld [vmem:[#allocation9 + $0x90] sm:$0xf]  ;;  %v1085_v35 = vld [vmem:[#allocation9 + $0x94] sm:$0xf0]  ;;  %v804_v37 = vld [vmem:[#allocation9] sm:$0xf]  ;;  %v813_v39 = vor.u32 %v1069_v31, %v812_v27  ;;  %v1013_v40 = vor.u32 %v1119_v33, %v1012_v32 }
  0x2f   :  { %613 = vmatpush.bf16.msrb.mxu0 %v837_v1  ;;  %626 = vmatpush.bf16.msrb.mxu1 %v901_v6  ;;  %v1067_v38 = vld [vmem:[#allocation9 + $0x4] sm:$0xf0]  ;;  %v868_v41 = vld [vmem:[#allocation9 + $0x80] sm:$0xf]  ;;  %v940_v42 = vld [vmem:[#allocation9 + $0x110] sm:$0xf]  ;;  %v877_v44 = vor.u32 %v1085_v35, %v876_v34 }
  0x30   :  { %v1101_v43 = vld [vmem:[#allocation9 + $0x114] sm:$0xf0]  ;;  %v1083_v45 = vld [vmem:[#allocation9 + $0x84] sm:$0xf0]  ;;  %v1004_v46 = vld [vmem:[#allocation9 + $0x190] sm:$0xf]  ;;  %v805_v53 = vor.u32 %v1067_v38, %v804_v37 }
  0x31   :  { %639 = vmatpush.bf16.msrb.mxu2 %v965_v12  ;;  %652 = vmatpush.bf16.msrb.mxu3 %v1029_v14  ;;  %v1117_v47 = vld [vmem:[#allocation9 + $0x194] sm:$0xf0]  ;;  %v1080_v48 = vld [vmem:[#allocation9 + $0x74] sm:$0xf]  ;;  %v862_v49 = vld [vmem:[#allocation9 + $0x78] sm:$0xf0]  ;;  %v941_v52 = vor.u32 %v1101_v43, %v940_v42  ;;  %v869_v59 = vor.u32 %v1083_v45, %v868_v41 }
  0x32   :  { %v1096_v50 = vld [vmem:[#allocation9 + $0xf4] sm:$0xf]  ;;  %v926_v51 = vld [vmem:[#allocation9 + $0xf8] sm:$0xf0]  ;;  %v1005_v54 = vor.u32 %v1117_v47, %v1004_v46  ;;  %v1078_v55 = vld [vmem:[#allocation9 + $0x64] sm:$0xf]  ;;  %v865_v60 = vor.u32 %v1080_v48, %v862_v49 }
  0x33   :  { %614 = vmatpush.bf16.msrb.mxu0 %v829_v13  ;;  %627 = vmatpush.bf16.msrb.mxu1 %v893_v18  ;;  %v932_v56 = vld [vmem:[#allocation9 + $0x100] sm:$0xf]  ;;  %v1099_v57 = vld [vmem:[#allocation9 + $0x104] sm:$0xf0]  ;;  %v1112_v62 = vld [vmem:[#allocation9 + $0x174] sm:$0xf]  ;;  %v929_v0 = vor.u32 %v1096_v50, %v926_v51 }
  0x34   :  { %v996_v58 = vld [vmem:[#allocation9 + $0x180] sm:$0xf]  ;;  %v1115_v61 = vld [vmem:[#allocation9 + $0x184] sm:$0xf0]  ;;  %v990_v63 = vld [vmem:[#allocation9 + $0x178] sm:$0xf0]  ;;  %v933_v6 = vor.u32 %v1099_v57, %v932_v56 }
  0x35   :  { %640 = vmatpush.bf16.msrb.mxu2 %v957_v24  ;;  %653 = vmatpush.bf16.msrb.mxu3 %v1021_v26  ;;  %v854_v1 = vld [vmem:[#allocation9 + $0x68] sm:$0xf0]  ;;  %v1128_v2 = vld [vmem:[#allocation9 + $0x1f4] sm:$0xf]  ;;  %v1054_v3 = vld [vmem:[#allocation9 + $0x1f8] sm:$0xf0]  ;;  %v997_v7 = vor.u32 %v1115_v61, %v996_v58  ;;  %v993_v8 = vor.u32 %v1112_v62, %v990_v63 }
  0x36   :  { %v1094_v4 = vld [vmem:[#allocation9 + $0xe4] sm:$0xf]  ;;  %v918_v5 = vld [vmem:[#allocation9 + $0xe8] sm:$0xf0]  ;;  %v857_v9 = vor.u32 %v1078_v55, %v854_v1  ;;  %v1057_v10 = vor.u32 %v1128_v2, %v1054_v3  ;;  %v1076_v12 = vld [vmem:[#allocation9 + $0x54] sm:$0xf] }
  0x37   :  { %615 = vmatpush.bf16.msrb.mxu0 %v821_v25  ;;  %628 = vmatpush.bf16.msrb.mxu1 %v885_v30  ;;  %v921_v11 = vor.u32 %v1094_v4, %v918_v5  ;;  %v846_v13 = vld [vmem:[#allocation9 + $0x58] sm:$0xf0]  ;;  %v1092_v14 = vld [vmem:[#allocation9 + $0xd4] sm:$0xf]  ;;  %v1110_v18 = vld [vmem:[#allocation9 + $0x164] sm:$0xf] }
  0x38   :  { %v849_v15 = vor.u32 %v1076_v12, %v846_v13  ;;  %v910_v16 = vld [vmem:[#allocation9 + $0xd8] sm:$0xf0]  ;;  %v982_v19 = vld [vmem:[#allocation9 + $0x168] sm:$0xf0]  ;;  %v1126_v20 = vld [vmem:[#allocation9 + $0x1e4] sm:$0xf] }
  0x39   :  { %641 = vmatpush.bf16.msrb.mxu2 %v949_v36  ;;  %654 = vmatpush.bf16.msrb.mxu3 %v1013_v40  ;;  %v913_v17 = vor.u32 %v1092_v14, %v910_v16  ;;  %v985_v21 = vor.u32 %v1110_v18, %v982_v19  ;;  %v1046_v22 = vld [vmem:[#allocation9 + $0x1e8] sm:$0xf0]  ;;  %v1074_v24 = vld [vmem:[#allocation9 + $0x44] sm:$0xf]  ;;  %v1108_v30 = vld [vmem:[#allocation9 + $0x154] sm:$0xf] }
  0x3a   :  { %v1049_v23 = vor.u32 %v1126_v20, %v1046_v22  ;;  %v838_v25 = vld [vmem:[#allocation9 + $0x48] sm:$0xf0]  ;;  %v1090_v26 = vld [vmem:[#allocation9 + $0xc4] sm:$0xf]  ;;  %v974_v31 = vld [vmem:[#allocation9 + $0x158] sm:$0xf0] }
  0x3b   :  { %616 = vmatpush.bf16.msrb.mxu0 %v813_v39  ;;  %629 = vmatpush.bf16.msrb.mxu1 %v877_v44  ;;  %v841_v27 = vor.u32 %v1074_v24, %v838_v25  ;;  %v902_v28 = vld [vmem:[#allocation9 + $0xc8] sm:$0xf0]  ;;  %v1124_v32 = vld [vmem:[#allocation9 + $0x1d4] sm:$0xf]  ;;  %v977_v33 = vor.u32 %v1108_v30, %v974_v31  ;;  %v1038_v34 = vld [vmem:[#allocation9 + $0x1d8] sm:$0xf0] }
  0x3c   :  { %v905_v29 = vor.u32 %v1090_v26, %v902_v28  ;;  %v1041_v35 = vor.u32 %v1124_v32, %v1038_v34  ;;  %v1072_v36 = vld [vmem:[#allocation9 + $0x34] sm:$0xf]  ;;  %v830_v37 = vld [vmem:[#allocation9 + $0x38] sm:$0xf0]  ;;  %v1106_v42 = vld [vmem:[#allocation9 + $0x144] sm:$0xf] }
  0x3d   :  { %642 = vmatpush.bf16.msrb.mxu2 %v941_v52  ;;  %655 = vmatpush.bf16.msrb.mxu3 %v1005_v54  ;;  %v1088_v38 = vld [vmem:[#allocation9 + $0xb4] sm:$0xf]  ;;  %v833_v39 = vor.u32 %v1072_v36, %v830_v37  ;;  %v894_v40 = vld [vmem:[#allocation9 + $0xb8] sm:$0xf0]  ;;  %v966_v43 = vld [vmem:[#allocation9 + $0x148] sm:$0xf0] }
  0x3e   :  { %v897_v41 = vor.u32 %v1088_v38, %v894_v40  ;;  %v1122_v44 = vld [vmem:[#allocation9 + $0x1c4] sm:$0xf]  ;;  %v969_v45 = vor.u32 %v1106_v42, %v966_v43  ;;  %v1030_v46 = vld [vmem:[#allocation9 + $0x1c8] sm:$0xf0]  ;;  %v1104_v54 = vld [vmem:[#allocation9 + $0x134] sm:$0xf] }
  0x3f   :  { %617 = vmatpush.bf16.msrb.mxu0 %v805_v53  ;;  %630 = vmatpush.bf16.msrb.mxu1 %v869_v59  ;;  %v1070_v47 = vld [vmem:[#allocation9 + $0x24] sm:$0xf]  ;;  %v822_v48 = vld [vmem:[#allocation9 + $0x28] sm:$0xf0]  ;;  %v1033_v49 = vor.u32 %v1122_v44, %v1030_v46  ;;  %v958_v55 = vld [vmem:[#allocation9 + $0x138] sm:$0xf0] }
  0x40   :  { %v825_v50 = vor.u32 %v1070_v47, %v822_v48  ;;  %v1086_v51 = vld [vmem:[#allocation9 + $0xa4] sm:$0xf]  ;;  %v886_v52 = vld [vmem:[#allocation9 + $0xa8] sm:$0xf0]  ;;  %v1120_v56 = vld [vmem:[#allocation9 + $0x1b4] sm:$0xf]  ;;  %v961_v57 = vor.u32 %v1104_v54, %v958_v55 }
  0x41   :  { %643 = vmatpush.bf16.msrb.mxu2 %v933_v6  ;;  %656 = vmatpush.bf16.msrb.mxu3 %v997_v7  ;;  %v889_v53 = vor.u32 %v1086_v51, %v886_v52  ;;  %v1022_v58 = vld [vmem:[#allocation9 + $0x1b8] sm:$0xf0]  ;;  %v1084_v62 = vld [vmem:[#allocation9 + $0x94] sm:$0xf]  ;;  %v1102_v1 = vld [vmem:[#allocation9 + $0x124] sm:$0xf] }
  0x42   :  { %v1025_v59 = vor.u32 %v1120_v56, %v1022_v58  ;;  %v814_v61 = vld [vmem:[#allocation9 + $0x18] sm:$0xf0]  ;;  %v950_v2 = vld [vmem:[#allocation9 + $0x128] sm:$0xf0]  ;;  %v1118_v5 = vld [vmem:[#allocation9 + $0x1a4] sm:$0xf] }
  0x43   :  { %662 = vmatpush.bf16.msra.mxu0 %v865_v60  ;;  %675 = vmatpush.bf16.msra.mxu1 %v929_v0  ;;  %v1068_v60 = vld [vmem:[#allocation9 + $0x14] sm:$0xf]  ;;  %v878_v0 = vld [vmem:[#allocation9 + $0x98] sm:$0xf0]  ;;  %v953_v4 = vor.u32 %v1102_v1, %v950_v2  ;;  %v1014_v6 = vld [vmem:[#allocation9 + $0x1a8] sm:$0xf0] }
  0x44   :  { %v817_v63 = vor.u32 %v1068_v60, %v814_v61  ;;  %v881_v3 = vor.u32 %v1084_v62, %v878_v0  ;;  %v1066_v7 = vld [vmem:[#allocation9 + $0x4] sm:$0xf]  ;;  %v1100_v14 = vld [vmem:[#allocation9 + $0x114] sm:$0xf]  ;;  %v1006_v18 = vld [vmem:[#allocation9 + $0x198] sm:$0xf0] }
  0x45   :  { %688 = vmatpush.bf16.msra.mxu2 %v993_v8  ;;  %701 = vmatpush.bf16.msra.mxu3 %v1057_v10  ;;  %v1017_v8 = vor.u32 %v1118_v5, %v1014_v6  ;;  %v1082_v10 = vld [vmem:[#allocation9 + $0x84] sm:$0xf]  ;;  %v1116_v16 = vld [vmem:[#allocation9 + $0x194] sm:$0xf]  ;;  %v998_v25 = vld [vmem:[#allocation9 + $0x188] sm:$0xf0] }
  0x46   :  { %v1009_v19 = vor.u32 %v1116_v16, %v1006_v18  ;;  %v1098_v20 = vld [vmem:[#allocation9 + $0x104] sm:$0xf]  ;;  %v284_v58 = vld [vmem:[%s1356_s4] sm:$0x3] }
  0x47   :  { %663 = vmatpush.bf16.msra.mxu0 %v857_v9  ;;  %676 = vmatpush.bf16.msra.mxu1 %v921_v11  ;;  %v806_v9 = vld [vmem:[#allocation9 + $0x8] sm:$0xf0]  ;;  %v1114_v22 = vld [vmem:[#allocation9 + $0x184] sm:$0xf]  ;;  %v286_v60 = vperm.slane %v284_v58, 0 }
  0x48   :  { %v870_v11 = vld [vmem:[#allocation9 + $0x88] sm:$0xf0]  ;;  %v809_v12 = vor.u32 %v1066_v7, %v806_v9  ;;  %v1001_v26 = vor.u32 %v1114_v22, %v998_v25  ;;  %v720_v16 = vld [vmem:[%s1357_s5] sm:$0x3]  ;;  %s1283_s5 = smov [#allocation11]  }
  0x49   :  { %689 = vmatpush.bf16.msra.mxu2 %v985_v21  ;;  %702 = vmatpush.bf16.msra.mxu3 %v1049_v23  ;;  %v873_v13 = vor.u32 %v1082_v10, %v870_v11  ;;  %v934_v21 = vld [vmem:[#allocation9 + $0x108] sm:$0xf0]  ;;  %v98_v23 = vld [vmem:[#allocation8] sm:$0xf]  ;;  %v722_v18 = vperm.slane %v720_v16, 0  ;;  %s752_s25 = sshll.u32 %s1283_s5, 4  ;;  %s753_s25 = int_to_ptr.vmem [resolvable:$true] %s752_s25 }
  0x4a   :  { %v937_v24 = vor.u32 %v1098_v20, %v934_v21  ;;  %v101_v28 = vperm.slane %v98_v23, 1  ;;  %v103_v36 = vperm.slane %v98_v23, 3 }
  0x4b   :  { %664 = vmatpush.bf16.msra.mxu0 %v849_v15  ;;  %677 = vmatpush.bf16.msra.mxu1 %v913_v17  ;;  %v942_v15 = vld [vmem:[#allocation9 + $0x118] sm:$0xf0] }
  0x4c   :  { %v945_v17 = vor.u32 %v1100_v14, %v942_v15 }
  0x4d   :  { %690 = vmatpush.bf16.msra.mxu2 %v977_v33  ;;  %703 = vmatpush.bf16.msra.mxu3 %v1041_v35  ;;  %v102_v35 = vperm.slane %v98_v23, 2 }
  0x4f   :  { %665 = vmatpush.bf16.msra.mxu0 %v841_v27  ;;  %678 = vmatpush.bf16.msra.mxu1 %v905_v29  ;;  %v100_v27 = vperm.slane %v98_v23, 0 }
  0x51   :  { %691 = vmatpush.bf16.msra.mxu2 %v969_v45  ;;  %704 = vmatpush.bf16.msra.mxu3 %v1033_v49 }
  0x53   :  { %666 = vmatpush.bf16.msra.mxu0 %v833_v39  ;;  %679 = vmatpush.bf16.msra.mxu1 %v897_v41 }
  0x55   :  { %692 = vmatpush.bf16.msra.mxu2 %v961_v57  ;;  %705 = vmatpush.bf16.msra.mxu3 %v1025_v59 }
  0x57   :  { %667 = vmatpush.bf16.msra.mxu0 %v825_v50  ;;  %680 = vmatpush.bf16.msra.mxu1 %v889_v53 }
  0x59   :  { %693 = vmatpush.bf16.msra.mxu2 %v953_v4  ;;  %706 = vmatpush.bf16.msra.mxu3 %v1017_v8 }
  0x5b   :  { %668 = vmatpush.bf16.msra.mxu0 %v817_v63  ;;  %681 = vmatpush.bf16.msra.mxu1 %v881_v3  ;;  %v287_v3 = vperm.slane %v284_v58, 1 }
  0x5d   :  { %694 = vmatpush.bf16.msra.mxu2 %v945_v17  ;;  %707 = vmatpush.bf16.msra.mxu3 %v1009_v19  ;;  %v723_v19 = vperm.slane %v720_v16, 1 }
  0x5f   :  { %669 = vmatpush.bf16.msra.mxu0 %v809_v12  ;;  %682 = vmatpush.bf16.msra.mxu1 %v873_v13 }
  0x61   :  { %695 = vmatpush.bf16.msra.mxu2 %v937_v24  ;;  %708 = vmatpush.bf16.msra.mxu3 %v1001_v26 }
  0x9f   :  { %v161_v29 = vpop.f32.mrf.mxu0  ;;  %v174_v31 = vpop.f32.mrf.mxu1 }
  0xa0   :  { %v162_v30 = vadd.f32 %v161_v29, %v100_v27  ;;  %v175_v32 = vadd.f32 %v174_v31, %v101_v28  ;;  %v1282_v28 = vmov 0   ;;  %v1141_v29 = vld [vmem:[#allocation2] ss:$0 sm:$0xff] }
  0xa1   :  { %1140 = vset.pattern.permute.xlu0 %v1282_v28 }
  0xa2   :  { %vm204_vm1 = vcmp.gt.f32.partialorder %v162_v30, 0.0  ;;  %v208_v33 = vmul.f32 0.2, %v162_v30  ;;  %vm205_vm2 = vcmp.gt.f32.partialorder %v175_v32, 0.0  ;;  %v209_v34 = vmul.f32 0.2, %v175_v32 }
  0xa4   :  { %v212_v37 = vsel %vm204_vm1, %v162_v30, %v208_v33  ;;  %v213_v39 = vsel %vm205_vm2, %v175_v32, %v209_v34 }
  0xa5   :  { %v216_v38 = vpack.c.bf16 %v212_v37, %v212_v37  ;;  %v217_v41 = vpack.c.bf16 %v213_v39, %v213_v39 }
  0xa7   :  { %v187_v40 = vpop.f32.mrf.mxu2  ;;  %v200_v43 = vpop.f32.mrf.mxu3  ;;  %618 = vmatmul.bf16.vlgmr.msrb.gmra.mxu0 %v216_v38  ;;  %631 = vmatmul.bf16.vlgmr.msrb.gmra.mxu1 %v217_v41 }
  0xa8   :  { %v188_v42 = vadd.f32 %v187_v40, %v102_v35  ;;  %v163_v44 = vpop.f32.mrf.mxu0  ;;  %v201_v45 = vadd.f32 %v200_v43, %v103_v36  ;;  %v176_v46 = vpop.f32.mrf.mxu1 }
  0xaa   :  { %vm206_vm3 = vcmp.gt.f32.partialorder %v188_v42, 0.0  ;;  %v210_v47 = vmul.f32 0.2, %v188_v42  ;;  %vm207_vm4 = vcmp.gt.f32.partialorder %v201_v45, 0.0  ;;  %v211_v48 = vmul.f32 0.2, %v201_v45 }
  0xac   :  { %v214_v49 = vsel %vm206_vm3, %v188_v42, %v210_v47  ;;  %v215_v51 = vsel %vm207_vm4, %v201_v45, %v211_v48 }
  0xad   :  { %v218_v50 = vpack.c.bf16 %v214_v49, %v214_v49  ;;  %v219_v52 = vpack.c.bf16 %v215_v51, %v215_v51 }
  0xaf   :  { %v189_v53 = vpop.f32.mrf.mxu2  ;;  %644 = vmatmul.bf16.vlgmr.msrb.gmra.mxu2 %v218_v50  ;;  %v202_v54 = vpop.f32.mrf.mxu3  ;;  %657 = vmatmul.bf16.vlgmr.msrb.gmra.mxu3 %v219_v52 }
  0xb7   :  { %670 = vmatmul.bf16.vlgmr.msra.gmra.mxu0 %v216_v38  ;;  %683 = vmatmul.bf16.vlgmr.msra.gmra.mxu1 %v217_v41 }
  0xbf   :  { %696 = vmatmul.bf16.vlgmr.msra.gmra.mxu2 %v218_v50  ;;  %709 = vmatmul.bf16.vlgmr.msra.gmra.mxu3 %v219_v52 }
 0x124   :  { %v619_v55 = vpop.f32.mrf.mxu0  ;;  %v632_v56 = vpop.f32.mrf.mxu1 }
 0x125   :  { %v620_v63 = vadd.f32 %v619_v55, %v286_v60 }
 0x127   :  { %v633_v2 = vadd.f32 %v632_v56, %v620_v63 }
 0x12c   :  { %v621_v57 = vpop.f32.mrf.mxu0  ;;  %v634_v59 = vpop.f32.mrf.mxu1 }
 0x132   :  { %v645_v61 = vpop.f32.mrf.mxu2  ;;  %v658_v62 = vpop.f32.mrf.mxu3 }
 0x133   :  { %v646_v5 = vadd.f32 %v645_v61, %v633_v2 }
 0x134   :  { %v671_v0 = vpop.f32.mrf.mxu0  ;;  %v684_v1 = vpop.f32.mrf.mxu1 }
 0x135   :  { %v672_v7 = vadd.f32 %v671_v0, %v287_v3  ;;  %v659_v10 = vadd.f32 %v658_v62, %v646_v5 }
 0x137   :  { %v685_v11 = vadd.f32 %v684_v1, %v672_v7  ;;  %v716_v13 = vmul.f32 0.2, %v659_v10  ;;  %vm714_vm5 = vcmp.gt.f32.partialorder %v659_v10, 0.0 }
 0x139   :  { %v718_v21 = vsel %vm714_vm5, %v659_v10, %v716_v13 }
 0x13a   :  { %v647_v4 = vpop.f32.mrf.mxu2  ;;  %v660_v6 = vpop.f32.mrf.mxu3  ;;  %v726_v24 = vmul.f32 %v722_v18, %v718_v21 }
 0x13c   :  { %v673_v8 = vpop.f32.mrf.mxu0  ;;  %v686_v9 = vpop.f32.mrf.mxu1 }
 0x142   :  { %v697_v12 = vpop.f32.mrf.mxu2  ;;  %v710_v15 = vpop.f32.mrf.mxu3 }
 0x143   :  { %v698_v14 = vadd.f32 %v697_v12, %v685_v11 }
 0x145   :  { %v711_v17 = vadd.f32 %v710_v15, %v698_v14 }
 0x147   :  { %vm715_vm6 = vcmp.gt.f32.partialorder %v711_v17, 0.0  ;;  %v717_v20 = vmul.f32 0.2, %v711_v17 }
 0x149   :  { %v719_v22 = vsel %vm715_vm6, %v711_v17, %v717_v20 }
 0x14a   :  { %v699_v23 = vpop.f32.mrf.mxu2  ;;  %v727_v25 = vmul.f32 %v723_v19, %v719_v22  ;;  %v712_v26 = vpop.f32.mrf.mxu3 }
 0x14c   :  { %v728_v27 = vadd.f32 %v727_v25, %v726_v24 }
 0x14e   :  { %729 = vadd.xlane.f32.xlu0 %v728_v27 }
 0x1c1   :  { %v730_v30 = vpop.xlane.xlu0 %729 }
 0x1c2   :  { %v735_v31 = vadd.f32 %v1141_v29, %v730_v30 }
 0x1c4   :  { %v736_v32 = vsub.f32 0.0, %v735_v31 }
 0x1c6   :  { %v737_v33 = vmul.f32 1.442695, %v736_v32 }
 0x1c8   :  { %1142 = vpow2.f32 %v737_v33 }
 0x1ce   :  { %v1143_v34 = vpop.eup %1142 }
 0x1cf   :  { %v739_v35 = vadd.f32 1.0, %v1143_v34 }
 0x1d1   :  { %1144 = vrcp.f32 %v739_v35 }
 0x1d7   :  { %v1145_v36 = vpop.eup %1144 }
 0x1d8   :  { %743 = vperm.xlu0 %1140, %v1145_v36  }
 0x24a   :  { %v744_v37 = vpop.permute.xlu0 %743 }
 0x24b   :  { %746 = vst [vmem:[#allocation11] sm:$0xff] %v744_v37 }
 0x24c   :  { %757 = dma.vmem_to_hbm [thread:$0]  %s753_s25, 128, %s755_s28, [#allocation5]  }
 0x24d   :  { %1272 = dma.done.wait [#allocation5], 128  }
 0x24e   :  { %1273 = vsyncadd [#allocation5], 4294967168 }
 0x24f   :  { %762 = vsyncpa [#allocation4], 1 }
 0x250   :  { %763 = vsyncpa [#allocation7], 1 }
 0x251   :  { %764 = vsyncpa [#allocation10], 1 }
 0x252   :  { %765 = vsyncpa [#allocation5], 1 }

</bundles_post_ra>
